<compile_context>
chip_gen: v6e
topology: v6e:2x2x1
jax: 0.10.0
libtpu: 0.0.40
codegen_flags: <defaults>
</compile_context>

<pallas_src>
import jax
import jax.numpy as jnp
from jax.experimental import pallas as pl
from jax.experimental.pallas import tpu as pltpu

_ROWS = 8  # sublane-aligned row count of the flattened layout


def _l1_balance_ce_kernel(binary_ref, tb_ref, thr_ref, gt_ref, mask_ref,
                          tmap_ref, tmask_ref,
                          neg_loss_ref, scal_ref,
                          acc_ref):
    """One (8, TILE_C) tile of the fused loss.

    acc_ref : (7, TILE_C) f32 VMEM scratch with lane-wise partial sums:
      row 0: sum(bce * positive)            row 4: sum(thresh_mask)
      row 1: sum(gt * mask)  (pos count)    row 5: sum(tb * gt * mask)  (dice inter)
      row 2: sum(negative)                  row 6: sum(tb * mask)       (dice p-sum)
      row 3: sum(|thr - thresh_map| * thresh_mask)
    scal_ref: (7,) f32 SMEM output, written once on the last grid step.
    """
    step = pl.program_id(0)

    @pl.when(step == 0)
    def _init():
        acc_ref[...] = jnp.zeros_like(acc_ref)

    f32 = jnp.float32
    pred = binary_ref[...].astype(f32)
    tb = tb_ref[...].astype(f32)
    thr = thr_ref[...].astype(f32)
    gt = gt_ref[...].astype(f32)
    mask = mask_ref[...].astype(f32)
    tmap = tmap_ref[...].astype(f32)
    tmask = tmask_ref[...].astype(f32)

    positive = gt * mask
    negative = mask - positive              # == (1 - gt) * mask (exact identity)

    # Single-log BCE (gt is binary in DBNet); torch clamps the log terms at -100.
    p_sel = jnp.where(gt >= 0.5, pred, 1.0 - pred)
    bce = -jnp.maximum(jnp.log(p_sel), -100.0)

    # Per-pixel hard-negative loss map for top-k mining (narrow bf16 writeback).
    neg_loss_ref[...] = (bce * negative).astype(neg_loss_ref.dtype)

    terms = (
        bce * positive,                     # 0: BCE positive-loss sum
        positive,                           # 1: positive count / dice g-sum
        negative,                           # 2: negative count
        jnp.abs(thr - tmap) * tmask,        # 3: masked-L1 numerator
        tmask,                              # 4: masked-L1 denominator
        tb * positive,                      # 5: dice intersection
        tb * mask,                          # 6: dice prediction sum
    )
    # Lane-wise accumulation: only a cheap sublane reduce per tile, no per-step
    # cross-lane reductions and no per-step SMEM rewrites.
    for i, t in enumerate(terms):
        acc_ref[i:i + 1, :] = acc_ref[i:i + 1, :] + jnp.sum(t, axis=0, keepdims=True)

    @pl.when(step == pl.num_programs(0) - 1)
    def _finalize():
        for i in range(7):
            scal_ref[i] = jnp.sum(acc_ref[i:i + 1, :])


def _round_up(x, m):
    return ((x + m - 1) // m) * m


def l1_balance_ce_loss(pred_binary, pred_thresh, pred_thresh_binary,
                       gt, mask, thresh_map, thresh_mask,
                       *, eps=1e-6, l1_scale=10.0, bce_scale=1.0,
                       negative_ratio=3.0, tile_lanes=32768, max_neg_count=None):
    """Fused DBNet L1BalanceCELoss forward.

    pred_* may be (N, 1, H, W) or (N, H, W); targets are (N, H, W). Inputs may be any
    float dtype (bf16 recommended); all math runs in f32 inside the kernel.
    `max_neg_count`: optional static cap for the hard-negative top-k (use at
    production sizes); None keeps the exact data-dependent top-k over all pixels.
    """
    total = gt.size
    tile_c = min(_round_up(int(tile_lanes), 128),
                 _round_up(pl.cdiv(total, _ROWS), 128))
    n_steps = pl.cdiv(total, _ROWS * tile_c)
    row_len = n_steps * tile_c
    padded = _ROWS * row_len

    def prep(x):
        # Keep native dtype (no f32 materialization in HBM). Zero padding is safe:
        # every padded contribution vanishes because mask/thresh_mask pad to 0.
        x = x.reshape(-1)
        if padded != total:
            x = jnp.pad(x, (0, padded - total))
        return x.reshape(_ROWS, row_len)

    inputs = (
        prep(pred_binary),
        prep(pred_thresh_binary),
        prep(pred_thresh),
        prep(gt),
        prep(mask),
        prep(thresh_map),
        prep(thresh_mask),
    )

    vspec = pl.BlockSpec((_ROWS, tile_c), lambda i: (0, i))
    neg_loss, scal = pl.pallas_call(
        _l1_balance_ce_kernel,
        grid=(n_steps,),
        in_specs=[vspec] * 7,
        out_specs=(
            vspec,
            pl.BlockSpec(memory_space=pltpu.MemorySpace.SMEM),
        ),
        out_shape=(
            jax.ShapeDtypeStruct((_ROWS, row_len), jnp.bfloat16),
            jax.ShapeDtypeStruct((7,), jnp.float32),
        ),
        scratch_shapes=[pltpu.VMEM((7, tile_c), jnp.float32)],
        compiler_params=pltpu.CompilerParams(
            dimension_semantics=("arbitrary",),
            vmem_limit_bytes=32 * 1024 * 1024,
        ),
    )(*inputs)
    # TODO(synk): on v7x, shard the lane range over a leading "parallel" grid axis
    # (one half per TensorCore) with a (2, 7) scalar output summed in the wrapper.

    pos_loss_sum = scal[0]
    pos_cnt = jnp.round(scal[1])          # sums are exactly integer-valued; round guards f32 accum
    neg_cnt_total = jnp.round(scal[2])
    l1_num = scal[3]
    l1_den = scal[4]
    dice_inter = scal[5]
    dice_p = scal[6]
    dice_g = scal[1]                      # sum(gt * mask) reused (== positive count)

    # --- BalanceCrossEntropyLoss: hard-negative mining ---
    neg_count = jnp.minimum(neg_cnt_total, pos_cnt * negative_ratio)
    neg_flat = neg_loss.reshape(-1).astype(jnp.float32)
    if max_neg_count is None:
        k_cap = neg_flat.shape[0]
    else:
        k_cap = min(int(max_neg_count), neg_flat.shape[0])
    # TODO(synk): the data-dependent-k top-k has no clean Pallas primitive; at
    # production sizes pass `max_neg_count` (or switch to an in-kernel histogram
    # threshold) so this bounded top_k stays cheap relative to the fused kernel.
    topk_vals = jax.lax.top_k(neg_flat, k_cap)[0]
    take = jnp.arange(k_cap, dtype=jnp.float32) < neg_count
    neg_topk_sum = jnp.sum(jnp.where(take, topk_vals, 0.0))
    bce_loss = (pos_loss_sum + neg_topk_sum) / (pos_cnt + neg_count + eps)

    # --- MaskL1Loss (returns 0 when the mask is empty; safe denom avoids NaN grads) ---
    l1_loss = jnp.where(l1_den > 0.0, l1_num / jnp.maximum(l1_den, 1e-12), 0.0)

    # --- DiceLoss ---
    dice_loss = 1.0 - 2.0 * dice_inter / (dice_p + dice_g + eps)

    loss = dice_loss + l1_scale * l1_loss + bce_scale * bce_loss
    metrics = dict(bce_loss=bce_loss, thresh_loss=dice_loss, l1_loss=l1_loss)
    return loss, metrics


if __name__ == "__main__":
    key = jax.random.PRNGKey(0)
    k1, k2, k3, k4, k5, k6 = jax.random.split(key, 6)

    N, H, W = 2, 16, 16

    # Predictions (NCHW, channel = 1), sigmoid-like values in (0, 1), stored as bf16
    # so the kernel consumes narrow native dtypes (upcast to f32 happens on-chip).
    pred_binary = jax.nn.sigmoid(jax.random.normal(k1, (N, 1, H, W))).astype(jnp.bfloat16)
    pred_thresh = jax.nn.sigmoid(jax.random.normal(k2, (N, 1, H, W))).astype(jnp.bfloat16)
    pred_thresh_binary = jax.nn.sigmoid(jax.random.normal(k3, (N, 1, H, W))).astype(jnp.bfloat16)

    # Targets (N, H, W).
    gt = (jax.random.uniform(k4, (N, H, W)) > 0.7).astype(jnp.bfloat16)
    mask = jnp.ones((N, H, W), jnp.bfloat16)
    thresh_map = jax.random.uniform(k5, (N, H, W), jnp.float32, 0.3, 0.7).astype(jnp.bfloat16)
    thresh_mask = (jax.random.uniform(k6, (N, H, W)) > 0.5).astype(jnp.bfloat16)

    loss, metrics = l1_balance_ce_loss(
        pred_binary, pred_thresh, pred_thresh_binary,
        gt, mask, thresh_map, thresh_mask)
    loss = jax.block_until_ready(loss)
    for v in metrics.values():
        jax.block_until_ready(v)

    assert jnp.isfinite(loss), "loss is not finite"
    print("KERNEL_OK")
</pallas_src>

<mosaic_0001>
module attributes {stable_mosaic.version = 11 : i64} {
  func.func @_l1_balance_ce_kernel(%arg0: i32, %arg1: memref<8x128xbf16, #tpu.memory_space<vmem>>, %arg2: memref<8x128xbf16, #tpu.memory_space<vmem>>, %arg3: memref<8x128xbf16, #tpu.memory_space<vmem>>, %arg4: memref<8x128xbf16, #tpu.memory_space<vmem>>, %arg5: memref<8x128xbf16, #tpu.memory_space<vmem>>, %arg6: memref<8x128xbf16, #tpu.memory_space<vmem>>, %arg7: memref<8x128xbf16, #tpu.memory_space<vmem>>, %arg8: memref<8x128xbf16, #tpu.memory_space<vmem>>, %arg9: memref<7xf32, #tpu.memory_space<smem>>, %arg10: memref<7x128xf32, #tpu.memory_space<vmem>>) attributes {dimension_semantics = [#tpu.dimension_semantics<arbitrary>], iteration_bounds = array<i64: 1>, scalar_prefetch = 0 : i64, scratch_operands = 1 : i64, tpu.core_type = #tpu.core_type<tc>, window_params = [{transform_indices = @transform_0, window_bounds = array<i64: 8, 128>}, {transform_indices = @transform_1, window_bounds = array<i64: 8, 128>}, {transform_indices = @transform_2, window_bounds = array<i64: 8, 128>}, {transform_indices = @transform_3, window_bounds = array<i64: 8, 128>}, {transform_indices = @transform_4, window_bounds = array<i64: 8, 128>}, {transform_indices = @transform_5, window_bounds = array<i64: 8, 128>}, {transform_indices = @transform_6, window_bounds = array<i64: 8, 128>}, {transform_indices = @transform_7, window_bounds = array<i64: 8, 128>}, {transform_indices = @transform_8, window_bounds = array<i64: 7>}]} {
    %c0_i32 = arith.constant 0 : i32
    %0 = arith.cmpi eq, %arg0, %c0_i32 : i32
    %1 = arith.extui %0 : i1 to i32
    %c0_i32_0 = arith.constant 0 : i32
    %2 = arith.cmpi ne, %1, %c0_i32_0 : i32
    scf.if %2 {
      %cst_50 = arith.constant 0.000000e+00 : f32
      %76 = vector.broadcast %cst_50 : f32 to vector<7x128xf32>
      %c0_51 = arith.constant 0 : index
      %c0_52 = arith.constant 0 : index
      %77 = vector.load %arg10[%c0_51, %c0_52] : memref<7x128xf32, #tpu.memory_space<vmem>>, vector<7x128xf32>
      tpu.vector_store %arg10[%c0_51, %c0_52], %76 {strides = array<i32>} : memref<7x128xf32, #tpu.memory_space<vmem>>, vector<7x128xf32>,
    } else {
    }
    %c0 = arith.constant 0 : index
    %c0_1 = arith.constant 0 : index
    %3 = vector.load %arg1[%c0, %c0_1] : memref<8x128xbf16, #tpu.memory_space<vmem>>, vector<8x128xbf16>
    %4 = arith.extf %3 : vector<8x128xbf16> to vector<8x128xf32>
    %c0_2 = arith.constant 0 : index
    %c0_3 = arith.constant 0 : index
    %5 = vector.load %arg2[%c0_2, %c0_3] : memref<8x128xbf16, #tpu.memory_space<vmem>>, vector<8x128xbf16>
    %6 = arith.extf %5 : vector<8x128xbf16> to vector<8x128xf32>
    %c0_4 = arith.constant 0 : index
    %c0_5 = arith.constant 0 : index
    %7 = vector.load %arg3[%c0_4, %c0_5] : memref<8x128xbf16, #tpu.memory_space<vmem>>, vector<8x128xbf16>
    %8 = arith.extf %7 : vector<8x128xbf16> to vector<8x128xf32>
    %c0_6 = arith.constant 0 : index
    %c0_7 = arith.constant 0 : index
    %9 = vector.load %arg4[%c0_6, %c0_7] : memref<8x128xbf16, #tpu.memory_space<vmem>>, vector<8x128xbf16>
    %10 = arith.extf %9 : vector<8x128xbf16> to vector<8x128xf32>
    %c0_8 = arith.constant 0 : index
    %c0_9 = arith.constant 0 : index
    %11 = vector.load %arg5[%c0_8, %c0_9] : memref<8x128xbf16, #tpu.memory_space<vmem>>, vector<8x128xbf16>
    %12 = arith.extf %11 : vector<8x128xbf16> to vector<8x128xf32>
    %c0_10 = arith.constant 0 : index
    %c0_11 = arith.constant 0 : index
    %13 = vector.load %arg6[%c0_10, %c0_11] : memref<8x128xbf16, #tpu.memory_space<vmem>>, vector<8x128xbf16>
    %14 = arith.extf %13 : vector<8x128xbf16> to vector<8x128xf32>
    %c0_12 = arith.constant 0 : index
    %c0_13 = arith.constant 0 : index
    %15 = vector.load %arg7[%c0_12, %c0_13] : memref<8x128xbf16, #tpu.memory_space<vmem>>, vector<8x128xbf16>
    %16 = arith.extf %15 : vector<8x128xbf16> to vector<8x128xf32>
    %17 = arith.mulf %10, %12 : vector<8x128xf32>
    %18 = arith.subf %12, %17 : vector<8x128xf32>
    %cst = arith.constant 5.000000e-01 : f32
    %19 = vector.broadcast %cst : f32 to vector<8x128xf32>
    %20 = arith.cmpf oge, %10, %19 : vector<8x128xf32>
    %cst_14 = arith.constant 1.000000e+00 : f32
    %21 = vector.broadcast %cst_14 : f32 to vector<8x128xf32>
    %22 = arith.subf %21, %4 : vector<8x128xf32>
    %23 = arith.select %20, %4, %22 : vector<8x128xi1>, vector<8x128xf32>
    %24 = math.log %23 : vector<8x128xf32>
    %cst_15 = arith.constant -1.000000e+02 : f32
    %25 = vector.broadcast %cst_15 : f32 to vector<8x128xf32>
    %26 = arith.maximumf %24, %25 : vector<8x128xf32>
    %cst_16 = arith.constant 0.000000e+00 : f32
    %27 = vector.broadcast %cst_16 : f32 to vector<8x128xf32>
    %28 = arith.subf %27, %26 : vector<8x128xf32>
    %29 = arith.mulf %28, %18 : vector<8x128xf32>
    %30 = arith.truncf %29 : vector<8x128xf32> to vector<8x128xbf16>
    %c0_17 = arith.constant 0 : index
    %c0_18 = arith.constant 0 : index
    %31 = vector.load %arg8[%c0_17, %c0_18] : memref<8x128xbf16, #tpu.memory_space<vmem>>, vector<8x128xbf16>
    tpu.vector_store %arg8[%c0_17, %c0_18], %30 {strides = array<i32>} : memref<8x128xbf16, #tpu.memory_space<vmem>>, vector<8x128xbf16>,
    %32 = arith.mulf %28, %17 : vector<8x128xf32>
    %33 = arith.subf %8, %14 : vector<8x128xf32>
    %34 = math.absf %33 : vector<8x128xf32>
    %35 = arith.mulf %34, %16 : vector<8x128xf32>
    %36 = arith.mulf %6, %17 : vector<8x128xf32>
    %37 = arith.mulf %6, %12 : vector<8x128xf32>
    %c0_19 = arith.constant 0 : index
    %c0_20 = arith.constant 0 : index
    %38 = vector.load %arg10[%c0_19, %c0_20] : memref<7x128xf32, #tpu.memory_space<vmem>>, vector<1x128xf32>
    %cst_21 = arith.constant dense<0.000000e+00> : vector<128xf32>
    %39 = vector.multi_reduction <add>, %32, %cst_21 [0] : vector<8x128xf32> to vector<128xf32>
    %40 = vector.shape_cast %39 : vector<128xf32> to vector<1x128xf32>
    %41 = arith.addf %38, %40 : vector<1x128xf32>
    %c0_22 = arith.constant 0 : index
    %c0_23 = arith.constant 0 : index
    %42 = vector.load %arg10[%c0_22, %c0_23] : memref<7x128xf32, #tpu.memory_space<vmem>>, vector<1x128xf32>
    tpu.vector_store %arg10[%c0_22, %c0_23], %41 {strides = array<i32>} : memref<7x128xf32, #tpu.memory_space<vmem>>, vector<1x128xf32>,
    %c1 = arith.constant 1 : index
    %c0_24 = arith.constant 0 : index
    %43 = vector.load %arg10[%c1, %c0_24] : memref<7x128xf32, #tpu.memory_space<vmem>>, vector<1x128xf32>
    %cst_25 = arith.constant dense<0.000000e+00> : vector<128xf32>
    %44 = vector.multi_reduction <add>, %17, %cst_25 [0] : vector<8x128xf32> to vector<128xf32>
    %45 = vector.shape_cast %44 : vector<128xf32> to vector<1x128xf32>
    %46 = arith.addf %43, %45 : vector<1x128xf32>
    %c1_26 = arith.constant 1 : index
    %c0_27 = arith.constant 0 : index
    %47 = vector.load %arg10[%c1_26, %c0_27] : memref<7x128xf32, #tpu.memory_space<vmem>>, vector<1x128xf32>
    tpu.vector_store %arg10[%c1_26, %c0_27], %46 {strides = array<i32>} : memref<7x128xf32, #tpu.memory_space<vmem>>, vector<1x128xf32>,
    %c2 = arith.constant 2 : index
    %c0_28 = arith.constant 0 : index
    %48 = vector.load %arg10[%c2, %c0_28] : memref<7x128xf32, #tpu.memory_space<vmem>>, vector<1x128xf32>
    %cst_29 = arith.constant dense<0.000000e+00> : vector<128xf32>
    %49 = vector.multi_reduction <add>, %18, %cst_29 [0] : vector<8x128xf32> to vector<128xf32>
    %50 = vector.shape_cast %49 : vector<128xf32> to vector<1x128xf32>
    %51 = arith.addf %48, %50 : vector<1x128xf32>
    %c2_30 = arith.constant 2 : index
    %c0_31 = arith.constant 0 : index
    %52 = vector.load %arg10[%c2_30, %c0_31] : memref<7x128xf32, #tpu.memory_space<vmem>>, vector<1x128xf32>
    tpu.vector_store %arg10[%c2_30, %c0_31], %51 {strides = array<i32>} : memref<7x128xf32, #tpu.memory_space<vmem>>, vector<1x128xf32>,
    %c3 = arith.constant 3 : index
    %c0_32 = arith.constant 0 : index
    %53 = vector.load %arg10[%c3, %c0_32] : memref<7x128xf32, #tpu.memory_space<vmem>>, vector<1x128xf32>
    %cst_33 = arith.constant dense<0.000000e+00> : vector<128xf32>
    %54 = vector.multi_reduction <add>, %35, %cst_33 [0] : vector<8x128xf32> to vector<128xf32>
    %55 = vector.shape_cast %54 : vector<128xf32> to vector<1x128xf32>
    %56 = arith.addf %53, %55 : vector<1x128xf32>
    %c3_34 = arith.constant 3 : index
    %c0_35 = arith.constant 0 : index
    %57 = vector.load %arg10[%c3_34, %c0_35] : memref<7x128xf32, #tpu.memory_space<vmem>>, vector<1x128xf32>
    tpu.vector_store %arg10[%c3_34, %c0_35], %56 {strides = array<i32>} : memref<7x128xf32, #tpu.memory_space<vmem>>, vector<1x128xf32>,
    %c4 = arith.constant 4 : index
    %c0_36 = arith.constant 0 : index
    %58 = vector.load %arg10[%c4, %c0_36] : memref<7x128xf32, #tpu.memory_space<vmem>>, vector<1x128xf32>
    %cst_37 = arith.constant dense<0.000000e+00> : vector<128xf32>
    %59 = vector.multi_reduction <add>, %16, %cst_37 [0] : vector<8x128xf32> to vector<128xf32>
    %60 = vector.shape_cast %59 : vector<128xf32> to vector<1x128xf32>
    %61 = arith.addf %58, %60 : vector<1x128xf32>
    %c4_38 = arith.constant 4 : index
    %c0_39 = arith.constant 0 : index
    %62 = vector.load %arg10[%c4_38, %c0_39] : memref<7x128xf32, #tpu.memory_space<vmem>>, vector<1x128xf32>
    tpu.vector_store %arg10[%c4_38, %c0_39], %61 {strides = array<i32>} : memref<7x128xf32, #tpu.memory_space<vmem>>, vector<1x128xf32>,
    %c5 = arith.constant 5 : index
    %c0_40 = arith.constant 0 : index
    %63 = vector.load %arg10[%c5, %c0_40] : memref<7x128xf32, #tpu.memory_space<vmem>>, vector<1x128xf32>
    %cst_41 = arith.constant dense<0.000000e+00> : vector<128xf32>
    %64 = vector.multi_reduction <add>, %36, %cst_41 [0] : vector<8x128xf32> to vector<128xf32>
    %65 = vector.shape_cast %64 : vector<128xf32> to vector<1x128xf32>
    %66 = arith.addf %63, %65 : vector<1x128xf32>
    %c5_42 = arith.constant 5 : index
    %c0_43 = arith.constant 0 : index
    %67 = vector.load %arg10[%c5_42, %c0_43] : memref<7x128xf32, #tpu.memory_space<vmem>>, vector<1x128xf32>
    tpu.vector_store %arg10[%c5_42, %c0_43], %66 {strides = array<i32>} : memref<7x128xf32, #tpu.memory_space<vmem>>, vector<1x128xf32>,
    %c6 = arith.constant 6 : index
    %c0_44 = arith.constant 0 : index
    %68 = vector.load %arg10[%c6, %c0_44] : memref<7x128xf32, #tpu.memory_space<vmem>>, vector<1x128xf32>
    %cst_45 = arith.constant dense<0.000000e+00> : vector<128xf32>
    %69 = vector.multi_reduction <add>, %37, %cst_45 [0] : vector<8x128xf32> to vector<128xf32>
    %70 = vector.shape_cast %69 : vector<128xf32> to vector<1x128xf32>
    %71 = arith.addf %68, %70 : vector<1x128xf32>
    %c6_46 = arith.constant 6 : index
    %c0_47 = arith.constant 0 : index
    %72 = vector.load %arg10[%c6_46, %c0_47] : memref<7x128xf32, #tpu.memory_space<vmem>>, vector<1x128xf32>
    tpu.vector_store %arg10[%c6_46, %c0_47], %71 {strides = array<i32>} : memref<7x128xf32, #tpu.memory_space<vmem>>, vector<1x128xf32>,
    %c0_i32_48 = arith.constant 0 : i32
    %73 = arith.cmpi eq, %arg0, %c0_i32_48 : i32
    %74 = arith.extui %73 : i1 to i32
    %c0_i32_49 = arith.constant 0 : i32
    %75 = arith.cmpi ne, %74, %c0_i32_49 : i32
    scf.if %75 {
      %c0_50 = arith.constant 0 : index
      %c0_51 = arith.constant 0 : index
      %76 = vector.load %arg10[%c0_50, %c0_51] : memref<7x128xf32, #tpu.memory_space<vmem>>, vector<1x128xf32>
      %77 = vector.shape_cast %76 : vector<1x128xf32> to vector<1x1x128xf32>
      %cst_52 = arith.constant dense<0.000000e+00> : vector<1xf32>
      %78 = vector.multi_reduction <add>, %77, %cst_52 [1, 2] : vector<1x1x128xf32> to vector<1xf32>
      %79 = vector.shape_cast %78 : vector<1xf32> to vector<1x1x1xf32>
      %80 = vector.extract %79[0, 0, 0] : f32 from vector<1x1x1xf32>
      %c0_53 = arith.constant 0 : index
      %81 = memref.load %arg9[%c0_53] : memref<7xf32, #tpu.memory_space<smem>>
      memref.store %80, %arg9[%c0_53] : memref<7xf32, #tpu.memory_space<smem>>
      %c1_54 = arith.constant 1 : index
      %c0_55 = arith.constant 0 : index
      %82 = vector.load %arg10[%c1_54, %c0_55] : memref<7x128xf32, #tpu.memory_space<vmem>>, vector<1x128xf32>
      %83 = vector.shape_cast %82 : vector<1x128xf32> to vector<1x1x128xf32>
      %cst_56 = arith.constant dense<0.000000e+00> : vector<1xf32>
      %84 = vector.multi_reduction <add>, %83, %cst_56 [1, 2] : vector<1x1x128xf32> to vector<1xf32>
      %85 = vector.shape_cast %84 : vector<1xf32> to vector<1x1x1xf32>
      %86 = vector.extract %85[0, 0, 0] : f32 from vector<1x1x1xf32>
      %c1_57 = arith.constant 1 : index
      %87 = memref.load %arg9[%c1_57] : memref<7xf32, #tpu.memory_space<smem>>
      memref.store %86, %arg9[%c1_57] : memref<7xf32, #tpu.memory_space<smem>>
      %c2_58 = arith.constant 2 : index
      %c0_59 = arith.constant 0 : index
      %88 = vector.load %arg10[%c2_58, %c0_59] : memref<7x128xf32, #tpu.memory_space<vmem>>, vector<1x128xf32>
      %89 = vector.shape_cast %88 : vector<1x128xf32> to vector<1x1x128xf32>
      %cst_60 = arith.constant dense<0.000000e+00> : vector<1xf32>
      %90 = vector.multi_reduction <add>, %89, %cst_60 [1, 2] : vector<1x1x128xf32> to vector<1xf32>
      %91 = vector.shape_cast %90 : vector<1xf32> to vector<1x1x1xf32>
      %92 = vector.extract %91[0, 0, 0] : f32 from vector<1x1x1xf32>
      %c2_61 = arith.constant 2 : index
      %93 = memref.load %arg9[%c2_61] : memref<7xf32, #tpu.memory_space<smem>>
      memref.store %92, %arg9[%c2_61] : memref<7xf32, #tpu.memory_space<smem>>
      %c3_62 = arith.constant 3 : index
      %c0_63 = arith.constant 0 : index
      %94 = vector.load %arg10[%c3_62, %c0_63] : memref<7x128xf32, #tpu.memory_space<vmem>>, vector<1x128xf32>
      %95 = vector.shape_cast %94 : vector<1x128xf32> to vector<1x1x128xf32>
      %cst_64 = arith.constant dense<0.000000e+00> : vector<1xf32>
      %96 = vector.multi_reduction <add>, %95, %cst_64 [1, 2] : vector<1x1x128xf32> to vector<1xf32>
      %97 = vector.shape_cast %96 : vector<1xf32> to vector<1x1x1xf32>
      %98 = vector.extract %97[0, 0, 0] : f32 from vector<1x1x1xf32>
      %c3_65 = arith.constant 3 : index
      %99 = memref.load %arg9[%c3_65] : memref<7xf32, #tpu.memory_space<smem>>
      memref.store %98, %arg9[%c3_65] : memref<7xf32, #tpu.memory_space<smem>>
      %c4_66 = arith.constant 4 : index
      %c0_67 = arith.constant 0 : index
      %100 = vector.load %arg10[%c4_66, %c0_67] : memref<7x128xf32, #tpu.memory_space<vmem>>, vector<1x128xf32>
      %101 = vector.shape_cast %100 : vector<1x128xf32> to vector<1x1x128xf32>
      %cst_68 = arith.constant dense<0.000000e+00> : vector<1xf32>
      %102 = vector.multi_reduction <add>, %101, %cst_68 [1, 2] : vector<1x1x128xf32> to vector<1xf32>
      %103 = vector.shape_cast %102 : vector<1xf32> to vector<1x1x1xf32>
      %104 = vector.extract %103[0, 0, 0] : f32 from vector<1x1x1xf32>
      %c4_69 = arith.constant 4 : index
      %105 = memref.load %arg9[%c4_69] : memref<7xf32, #tpu.memory_space<smem>>
      memref.store %104, %arg9[%c4_69] : memref<7xf32, #tpu.memory_space<smem>>
      %c5_70 = arith.constant 5 : index
      %c0_71 = arith.constant 0 : index
      %106 = vector.load %arg10[%c5_70, %c0_71] : memref<7x128xf32, #tpu.memory_space<vmem>>, vector<1x128xf32>
      %107 = vector.shape_cast %106 : vector<1x128xf32> to vector<1x1x128xf32>
      %cst_72 = arith.constant dense<0.000000e+00> : vector<1xf32>
      %108 = vector.multi_reduction <add>, %107, %cst_72 [1, 2] : vector<1x1x128xf32> to vector<1xf32>
      %109 = vector.shape_cast %108 : vector<1xf32> to vector<1x1x1xf32>
      %110 = vector.extract %109[0, 0, 0] : f32 from vector<1x1x1xf32>
      %c5_73 = arith.constant 5 : index
      %111 = memref.load %arg9[%c5_73] : memref<7xf32, #tpu.memory_space<smem>>
      memref.store %110, %arg9[%c5_73] : memref<7xf32, #tpu.memory_space<smem>>
      %c6_74 = arith.constant 6 : index
      %c0_75 = arith.constant 0 : index
      %112 = vector.load %arg10[%c6_74, %c0_75] : memref<7x128xf32, #tpu.memory_space<vmem>>, vector<1x128xf32>
      %113 = vector.shape_cast %112 : vector<1x128xf32> to vector<1x1x128xf32>
      %cst_76 = arith.constant dense<0.000000e+00> : vector<1xf32>
      %114 = vector.multi_reduction <add>, %113, %cst_76 [1, 2] : vector<1x1x128xf32> to vector<1xf32>
      %115 = vector.shape_cast %114 : vector<1xf32> to vector<1x1x1xf32>
      %116 = vector.extract %115[0, 0, 0] : f32 from vector<1x1x1xf32>
      %c6_77 = arith.constant 6 : index
      %117 = memref.load %arg9[%c6_77] : memref<7xf32, #tpu.memory_space<smem>>
      memref.store %116, %arg9[%c6_77] : memref<7xf32, #tpu.memory_space<smem>>
    } else {
    }
    return
  }
  func.func @transform_0(%arg0: i32) -> (i32, i32) {
    %c0_i32 = arith.constant 0 : i32
    %c0_i32_0 = arith.constant 0 : i32
    return %c0_i32, %arg0 : i32, i32
  }
  func.func @transform_1(%arg0: i32) -> (i32, i32) {
    %c0_i32 = arith.constant 0 : i32
    %c0_i32_0 = arith.constant 0 : i32
    return %c0_i32, %arg0 : i32, i32
  }
  func.func @transform_2(%arg0: i32) -> (i32, i32) {
    %c0_i32 = arith.constant 0 : i32
    %c0_i32_0 = arith.constant 0 : i32
    return %c0_i32, %arg0 : i32, i32
  }
  func.func @transform_3(%arg0: i32) -> (i32, i32) {
    %c0_i32 = arith.constant 0 : i32
    %c0_i32_0 = arith.constant 0 : i32
    return %c0_i32, %arg0 : i32, i32
  }
  func.func @transform_4(%arg0: i32) -> (i32, i32) {
    %c0_i32 = arith.constant 0 : i32
    %c0_i32_0 = arith.constant 0 : i32
    return %c0_i32, %arg0 : i32, i32
  }
  func.func @transform_5(%arg0: i32) -> (i32, i32) {
    %c0_i32 = arith.constant 0 : i32
    %c0_i32_0 = arith.constant 0 : i32
    return %c0_i32, %arg0 : i32, i32
  }
  func.func @transform_6(%arg0: i32) -> (i32, i32) {
    %c0_i32 = arith.constant 0 : i32
    %c0_i32_0 = arith.constant 0 : i32
    return %c0_i32, %arg0 : i32, i32
  }
  func.func @transform_7(%arg0: i32) -> (i32, i32) {
    %c0_i32 = arith.constant 0 : i32
    %c0_i32_0 = arith.constant 0 : i32
    return %c0_i32, %arg0 : i32, i32
  }
  func.func @transform_8(%arg0: i32) -> i32 {
    %c0_i32 = arith.constant 0 : i32
    %c0_i32_0 = arith.constant 0 : i32
    return %c0_i32 : i32
  }
}

</mosaic_0001>

<bundles_post_ra>
// kernel: tpu_custom_call.1
= control target key start
LH: loop header
LB: loop body
LE: loop exit
PB: predicated region body
PF: predicated region fallthrough
CT: control target
= control target key end

     0   :  { %14 = vsyncpa [#allocation4], 0  ;;  %s574_s0 = inlined_call_operand.hbm [shape: bf16[8,128], index: 0, kind: input, shape index: {}]   ;;  %s575_s1 = inlined_call_operand.hbm [shape: bf16[8,128], index: 1, kind: input, shape index: {}]   ;;  %s576_s2 = inlined_call_operand.hbm [shape: bf16[8,128], index: 2, kind: input, shape index: {}]   ;;  %s577_s3 = inlined_call_operand.vmem [shape: bf16[8,128], index: 3, kind: input, shape index: {}]   ;;  %s578_s4 = inlined_call_operand.hbm [shape: bf16[8,128], index: 4, kind: input, shape index: {}]   ;;  %s579_s5 = inlined_call_operand.vmem [shape: bf16[8,128], index: 5, kind: input, shape index: {}]   ;;  %s580_s6 = inlined_call_operand.hbm [shape: bf16[8,128], index: 6, kind: input, shape index: {}]   ;;  %s581_s7 = inlined_call_operand.hbm [shape: bf16[8,128], index: 7, kind: output, shape index: {0}]   ;;  %s582_s8 = inlined_call_operand.hbm [shape: f32[7], index: 8, kind: output, shape index: {1}]  }
   0x1   :  { %15 = vsyncpa [#allocation8], 0 }
   0x2   :  { %16 = vsyncpa [#allocation11], 0 }
   0x3   :  { %17 = vsyncpa [#allocation5], 0 }
   0x4   :  { %18 = vsyncpa [#allocation6], 0  ;;  %s475_s27 = smov [#allocation7]   ;;  %s476_s29 = smov [#allocation10]  }
   0x5   :  { %s35_s28 = sshll.u32 %s475_s27, 4  ;;  %s57_s30 = sshll.u32 %s476_s29, 4  ;;  %s36_s28 = int_to_ptr.vmem [resolvable:$true] %s35_s28  ;;  %s58_s30 = int_to_ptr.vmem [resolvable:$true] %s57_s30 }
   0x6   :  { %s345_s9 = scalar_lea.vmem %s36_s28, 64  ;;  %p350_p1 = scmp.lt.s32.totalorder %s36_s28, %s36_s28 }
   0x7   :  { %p346_p0 = scmp.ne.s32.totalorder %s36_s28, %s345_s9  ;;  %p351_p2 = scmp.lt.s32.totalorder %s345_s9, %s345_s9 }
   0x9   :  { %p352_p3 = por %p351_p2, %p350_p1 }
   0xb   :  { %p353_p4 = pnand %p352_p3, %p346_p0 }
   0xd   :  { %356 = shalt.err (!%p353_p4)
}
   0xe   :  { %38 = dma.hbm_to_vmem [thread:$0]  %s575_s1, 64, %s36_s28, [#allocation8]  }
   0xf   :  { %s365_s12 = scalar_lea.vmem %s58_s30, 64  ;;  %p370_p6 = scmp.lt.s32.totalorder %s58_s30, %s58_s30 }
  0x10   :  { %p366_p5 = scmp.ne.s32.totalorder %s58_s30, %s365_s12  ;;  %p371_p7 = scmp.lt.s32.totalorder %s365_s12, %s365_s12 }
  0x12   :  { %p372_p8 = por %p371_p7, %p370_p6 }
  0x14   :  { %p373_p9 = pnand %p372_p8, %p366_p5 }
  0x16   :  { %376 = shalt.err (!%p373_p9)
}
  0x17   :  { %60 = dma.hbm_to_vmem [thread:$0]  %s578_s4, 64, %s58_s30, [#allocation11]  }
  0x18   :  { %s477_s15 = smov [#allocation3]   ;;  %s478_s17 = smov [#allocation9]  }
  0x19   :  { %s25_s16 = sshll.u32 %s477_s15, 4  ;;  %s45_s18 = sshll.u32 %s478_s17, 4  ;;  %s26_s16 = int_to_ptr.vmem [resolvable:$true] %s25_s16  ;;  %s46_s18 = int_to_ptr.vmem [resolvable:$true] %s45_s18 }
  0x1a   :  { %s385_s19 = scalar_lea.vmem %s26_s16, 64  ;;  %p390_p11 = scmp.lt.s32.totalorder %s26_s16, %s26_s16 }
  0x1b   :  { %p386_p10 = scmp.ne.s32.totalorder %s26_s16, %s385_s19  ;;  %p391_p12 = scmp.lt.s32.totalorder %s385_s19, %s385_s19 }
  0x1d   :  { %p392_p13 = por %p391_p12, %p390_p11 }
  0x1f   :  { %p393_p0 = pnand %p392_p13, %p386_p10 }
  0x21   :  { %396 = shalt.err (!%p393_p0)
}
  0x22   :  { %28 = dma.hbm_to_vmem [thread:$0]  %s574_s0, 64, %s26_s16, [#allocation4]  }
  0x23   :  { %s405_s21 = scalar_lea.vmem %s46_s18, 64  ;;  %p410_p2 = scmp.lt.s32.totalorder %s46_s18, %s46_s18 }
  0x24   :  { %p406_p1 = scmp.ne.s32.totalorder %s46_s18, %s405_s21  ;;  %p411_p3 = scmp.lt.s32.totalorder %s405_s21, %s405_s21 }
  0x26   :  { %p412_p4 = por %p411_p3, %p410_p2 }
  0x28   :  { %p413_p5 = pnand %p412_p4, %p406_p1 }
  0x2a   :  { %416 = shalt.err (!%p413_p5)
}
  0x2b   :  { %48 = dma.hbm_to_vmem [thread:$0]  %s576_s2, 64, %s46_s18, [#allocation8]  }
  0x2c   :  { %s479_s23 = smov [#allocation12]  }
  0x2d   :  { %s69_s24 = sshll.u32 %s479_s23, 4  ;;  %s70_s24 = int_to_ptr.vmem [resolvable:$true] %s69_s24 }
  0x2e   :  { %s425_s25 = scalar_lea.vmem %s70_s24, 64  ;;  %p430_p7 = scmp.lt.s32.totalorder %s70_s24, %s70_s24 }
  0x2f   :  { %p426_p6 = scmp.ne.s32.totalorder %s70_s24, %s425_s25  ;;  %p431_p8 = scmp.lt.s32.totalorder %s425_s25, %s425_s25 }
  0x31   :  { %p432_p9 = por %p431_p8, %p430_p7 }
  0x33   :  { %p433_p10 = pnand %p432_p9, %p426_p6 }
  0x35   :  { %436 = shalt.err (!%p433_p10)
}
  0x36   :  { %72 = dma.hbm_to_vmem [thread:$0]  %s580_s6, 64, %s70_s24, [#allocation11]  }
  0x37   :  { %465 = dma.done.wait [#allocation4], 64  }
  0x38   :  { %466 = vsyncadd [#allocation4], 4294967232 }
  0x39   :  { %467 = dma.done.wait [#allocation8], 128  }
  0x3a   :  { %468 = vsyncadd [#allocation8], 4294967168 }
  0x3b   :  { %469 = dma.done.wait [#allocation11], 128  }
  0x3c   :  { %470 = vsyncadd [#allocation11], 4294967168  ;;  %v480_v0 = vmov 0.0   ;;  %v105_v1 = vld [vmem:[#allocation12] sm:$0xf]  ;;  %vm192_vm1 = vcmask 1040384  }
  0x3d   :  { %92 = vst [vmem:[#allocation2] sm:$0x7f] %v480_v0  ;;  %v99_v2 = vld [vmem:[%s577_s3] sm:$0xf]  ;;  %v101_v3 = vld [vmem:[#allocation10] sm:$0xf]  ;;  %v106_v4 = vunpack.c.l.bf16 %v105_v1 }
  0x3e   :  { %v100_v5 = vunpack.c.l.bf16 %v99_v2  ;;  %v102_v6 = vunpack.c.l.bf16 %v101_v3  ;;  %v97_v7 = vld [vmem:[#allocation9] sm:$0xf]  ;;  %v103_v8 = vld [vmem:[%s579_s5] sm:$0xf]  ;;  %v95_v13 = vld [vmem:[#allocation7] sm:$0xf] }
  0x3f   :  { %v162_v9 = vrot.slane %v106_v4, 4  ;;  %v98_v11 = vunpack.c.l.bf16 %v97_v7  ;;  %v104_v12 = vunpack.c.l.bf16 %v103_v8  ;;  %v96_v14 = vunpack.c.l.bf16 %v95_v13  ;;  %v93_v15 = vld [vmem:[#allocation3] sm:$0xf]  ;;  %s481_s3 = smov [#allocation13]  }
  0x40   :  { %v549_v10 = vmul.f32 %v102_v6, %v100_v5  ;;  %v94_v21 = vunpack.c.l.bf16 %v93_v15  ;;  %vm109_vm0 = vcmp.ge.f32.partialorder %v100_v5, 0.5  ;;  %s289_s5 = sshll.u32 %s481_s3, 4  ;;  %s290_s5 = int_to_ptr.vmem [resolvable:$true] %s289_s5 }
  0x41   :  { %v163_v16 = vadd.f32 %v162_v9, %v106_v4  ;;  %v120_v19 = vsub.f32 %v98_v11, %v104_v12  ;;  %v124_v22 = vmul.f32 %v102_v6, %v96_v14  ;;  %s437_s29 = scalar_lea.vmem %s290_s5, 64  ;;  %p442_p12 = scmp.lt.s32.totalorder %s290_s5, %s290_s5 }
  0x42   :  { %v552_v17 = vsub.f32 %v102_v6, %v549_v10  ;;  %v135_v18 = vrot.slane %v549_v10, 4  ;;  %v123_v20 = vmul.f32 %v549_v10, %v96_v14  ;;  %v110_v28 = vsub.f32 1.0, %v94_v21  ;;  %p438_p11 = scmp.ne.s32.totalorder %s290_s5, %s437_s29  ;;  %p443_p13 = scmp.lt.s32.totalorder %s437_s29, %s437_s29 }
  0x43   :  { %v164_v23 = vrot.slane %v163_v16, 2  ;;  %v121_v26 = vand.u32 2147483647, %v120_v19  ;;  %v180_v29 = vrot.slane %v124_v22, 4 }
  0x44   :  { %v144_v24 = vrot.slane %v552_v17, 4  ;;  %v136_v25 = vadd.f32 %v135_v18, %v549_v10  ;;  %v171_v27 = vrot.slane %v123_v20, 4  ;;  %v111_v35 = vsel %vm109_vm0, %v94_v21, %v110_v28  ;;  %v161_v41 = vld [vmem:[#allocation2 + $0x4] sm:$0x1]  ;;  %v134_v48 = vld [vmem:[#allocation2 + $0x1] sm:$0x1]  ;;  %p444_p0 = por %p443_p13, %p442_p12 }
  0x45   :  { %v165_v30 = vadd.f32 %v164_v23, %v163_v16  ;;  %v122_v33 = vmul.f32 %v121_v26, %v106_v4  ;;  %v181_v36 = vadd.f32 %v180_v29, %v124_v22  ;;  %335 = vlog2.f32 %v111_v35  ;;  %v143_v55 = vld [vmem:[#allocation2 + $0x2] sm:$0x1]  ;;  %v170_v61 = vld [vmem:[#allocation2 + $0x5] sm:$0x1]  ;;  %v179_v62 = vld [vmem:[#allocation2 + $0x6] sm:$0x1] }
  0x46   :  { %v145_v31 = vadd.f32 %v144_v24, %v552_v17  ;;  %v137_v32 = vrot.slane %v136_v25, 2  ;;  %v172_v34 = vadd.f32 %v171_v27, %v123_v20  ;;  %v152_v3 = vld [vmem:[#allocation2 + $0x3] sm:$0x1]  ;;  %p445_p1 = pnand %p444_p0, %p438_p11 }
  0x47   :  { %v166_v37 = vrot.slane %v165_v30, 1  ;;  %v153_v40 = vrot.slane %v122_v33, 4  ;;  %v182_v43 = vrot.slane %v181_v36, 2 }
  0x48   :  { %v146_v38 = vrot.slane %v145_v31, 2  ;;  %v138_v39 = vadd.f32 %v137_v32, %v136_v25  ;;  %v173_v42 = vrot.slane %v172_v34, 2 }
  0x49   :  { %v167_v44 = vadd.f32 %v166_v37, %v165_v30  ;;  %v154_v47 = vadd.f32 %v153_v40, %v122_v33  ;;  %v183_v50 = vadd.f32 %v182_v43, %v181_v36  ;;  %v125_v30 = vld [vmem:[#allocation2] sm:$0x1] }
  0x4a   :  { %v147_v45 = vadd.f32 %v146_v38, %v145_v31  ;;  %v139_v46 = vrot.slane %v138_v39, 1  ;;  %v174_v49 = vadd.f32 %v173_v42, %v172_v34 }
  0x4b   :  { %v168_v51 = vadd.f32 %v167_v44, %v161_v41  ;;  %v155_v54 = vrot.slane %v154_v47, 2  ;;  %v184_v57 = vrot.slane %v183_v50, 1 }
  0x4c   :  { %v148_v52 = vrot.slane %v147_v45, 1  ;;  %v140_v53 = vadd.f32 %v139_v46, %v138_v39  ;;  %v175_v56 = vrot.slane %v174_v49, 1 }
  0x4d   :  { %169 = vst [vmem:[#allocation2 + $0x4] sm:$0x1] %v168_v51  ;;  %v156_v60 = vadd.f32 %v155_v54, %v154_v47  ;;  %v185_v0 = vadd.f32 %v184_v57, %v183_v50 }
  0x4e   :  { %v149_v58 = vadd.f32 %v148_v52, %v147_v45  ;;  %v141_v59 = vadd.f32 %v140_v53, %v134_v48  ;;  %v176_v63 = vadd.f32 %v175_v56, %v174_v49 }
  0x4f   :  { %v157_v2 = vrot.slane %v156_v60, 1  ;;  %v186_v5 = vadd.f32 %v185_v0, %v179_v62 }
  0x50   :  { %v150_v1 = vadd.f32 %v149_v58, %v143_v55  ;;  %142 = vst [vmem:[#allocation2 + $0x1] sm:$0x1] %v141_v59  ;;  %v177_v4 = vadd.f32 %v176_v63, %v170_v61 }
  0x51   :  { %v158_v6 = vadd.f32 %v157_v2, %v156_v60  ;;  %187 = vst [vmem:[#allocation2 + $0x6] sm:$0x1] %v186_v5 }
  0x52   :  { %151 = vst [vmem:[#allocation2 + $0x2] sm:$0x1] %v150_v1  ;;  %178 = vst [vmem:[#allocation2 + $0x5] sm:$0x1] %v177_v4  ;;  %v336_v9 = vpop.eup %335 }
  0x53   :  { %v159_v7 = vadd.f32 %v158_v6, %v152_v3  ;;  %v113_v13 = vmul.f32 0.6931472, %v336_v9 }
  0x54   :  { %v244_v8 = vld [vmem:[#allocation2 + $0x4] sm:$0x1] }
  0x55   :  { %v245_v11 = vsel %vm192_vm1, %v244_v8, 0.0  ;;  %160 = vst [vmem:[#allocation2 + $0x3] sm:$0x1] %v159_v7  ;;  %v114_v16 = vmax.f32 %v113_v13, -100.0 }
  0x56   :  { %246 = vadd.xlane.f32.xlu0 %v245_v11 }
  0x57   :  { %v205_v12 = vld [vmem:[#allocation2 + $0x1] sm:$0x1]  ;;  %v115_v19 = vsub.f32 0.0, %v114_v16 }
  0x58   :  { %v206_v14 = vsel %vm192_vm1, %v205_v12, 0.0  ;;  %v270_v34 = vld [vmem:[#allocation2 + $0x6] sm:$0x1] }
  0x59   :  { %v218_v15 = vld [vmem:[#allocation2 + $0x2] sm:$0x1]  ;;  %v257_v21 = vld [vmem:[#allocation2 + $0x5] sm:$0x1]  ;;  %v119_v22 = vmul.f32 %v115_v19, %v549_v10  ;;  %v271_v10 = vsel %vm192_vm1, %v270_v34, 0.0  ;;  %v116_v36 = vmul.f32 %v115_v19, %v552_v17 }
  0x5a   :  { %v219_v18 = vsel %vm192_vm1, %v218_v15, 0.0  ;;  %207 = vadd.xlane.f32.xlu0 %v206_v14  ;;  %v258_v25 = vsel %vm192_vm1, %v257_v21, 0.0 }
  0x5b   :  { %220 = vadd.xlane.f32.xlu1 %v219_v18  ;;  %v126_v24 = vrot.slane %v119_v22, 4  ;;  %v117_v37 = vpack.c.bf16 %v116_v36, %v116_v36 }
  0x5c   :  { %v231_v20 = vld [vmem:[#allocation2 + $0x3] sm:$0x1] }
  0x5d   :  { %v232_v23 = vsel %vm192_vm1, %v231_v20, 0.0  ;;  %v127_v26 = vadd.f32 %v126_v24, %v119_v22  ;;  %118 = vst [vmem:[#allocation13] sm:$0xf] %v117_v37 }
  0x5f   :  { %233 = vadd.xlane.f32.xlu1 %v232_v23  ;;  %v128_v27 = vrot.slane %v127_v26, 2 }
  0x61   :  { %v129_v28 = vadd.f32 %v128_v27, %v127_v26 }
  0x63   :  { %259 = vadd.xlane.f32.xlu1 %v258_v25  ;;  %v130_v29 = vrot.slane %v129_v28, 1 }
  0x65   :  { %v131_v31 = vadd.f32 %v130_v29, %v129_v28 }
  0x67   :  { %v132_v32 = vadd.f32 %v131_v31, %v125_v30 }
  0x69   :  { %133 = vst [vmem:[#allocation2] sm:$0x1] %v132_v32 }
  0x70   :  { %v191_v33 = vld [vmem:[#allocation2] sm:$0x1] }
  0x71   :  { %v193_v35 = vsel %vm192_vm1, %v191_v33, 0.0 }
  0x72   :  { %194 = vadd.xlane.f32.xlu0 %v193_v35 }
  0x76   :  { %272 = vadd.xlane.f32.xlu0 %v271_v10 }
  0x77   :  { %448 = shalt.err (!%p445_p1)
}
  0x78   :  { %292 = dma.vmem_to_hbm [thread:$0]  %s290_s5, 64, %s581_s7, [#allocation5]  }
  0x79   :  { %s482_s16 = smov [#allocation14]  }
  0xdf   :  { %v247_v39 = vpop.xlane.xlu0 %246 }
  0xe0   :  { %v248_v45 = vrot.slane %v247_v39, 4 }
  0xe2   :  { %v249_v50 = vadd.f32 %v248_v45, %v247_v39 }
  0xe3   :  { %v208_v17 = vpop.xlane.xlu0 %207 }
  0xe4   :  { %v221_v38 = vpop.xlane.xlu1 %220  ;;  %v209_v41 = vrot.slane %v208_v17, 4  ;;  %v250_v57 = vrot.slane %v249_v50, 2 }
  0xe5   :  { %v222_v42 = vrot.slane %v221_v38, 4 }
  0xe6   :  { %v210_v46 = vadd.f32 %v209_v41, %v208_v17  ;;  %v251_v4 = vadd.f32 %v250_v57, %v249_v50 }
  0xe7   :  { %v223_v48 = vadd.f32 %v222_v42, %v221_v38 }
  0xe8   :  { %v234_v40 = vpop.xlane.xlu1 %233  ;;  %v211_v51 = vrot.slane %v210_v46, 2  ;;  %v252_v14 = vrot.slane %v251_v4, 1 }
  0xe9   :  { %v235_v44 = vrot.slane %v234_v40, 4  ;;  %v224_v54 = vrot.slane %v223_v48, 2 }
  0xea   :  { %v212_v61 = vadd.f32 %v211_v51, %v210_v46  ;;  %v253_v21 = vadd.f32 %v252_v14, %v251_v4 }
  0xeb   :  { %v236_v49 = vadd.f32 %v235_v44, %v234_v40  ;;  %v225_v0 = vadd.f32 %v224_v54, %v223_v48 }
  0xec   :  { %v260_v43 = vpop.xlane.xlu1 %259  ;;  %v213_v6 = vrot.slane %v212_v61, 1 }
  0xed   :  { %v261_v47 = vrot.slane %v260_v43, 4  ;;  %v237_v56 = vrot.slane %v236_v49, 2  ;;  %v226_v9 = vrot.slane %v225_v0, 1 }
  0xee   :  { %v214_v15 = vadd.f32 %v213_v6, %v212_v61 }
  0xef   :  { %v262_v52 = vadd.f32 %v261_v47, %v260_v43  ;;  %v238_v1 = vadd.f32 %v237_v56, %v236_v49  ;;  %v227_v18 = vadd.f32 %v226_v9, %v225_v0 }
  0xf1   :  { %v263_v59 = vrot.slane %v262_v52, 2  ;;  %v239_v11 = vrot.slane %v238_v1, 1 }
  0xf3   :  { %v264_v5 = vadd.f32 %v263_v59, %v262_v52  ;;  %v240_v20 = vadd.f32 %v239_v11, %v238_v1 }
  0xf5   :  { %v265_v16 = vrot.slane %v264_v5, 1 }
  0xf7   :  { %v266_v23 = vadd.f32 %v265_v16, %v264_v5 }
  0xfb   :  { %v195_v53 = vpop.xlane.xlu0 %194 }
  0xfc   :  { %v196_v55 = vrot.slane %v195_v53, 4 }
  0xfe   :  { %v197_v58 = vadd.f32 %v196_v55, %v195_v53 }
  0xff   :  { %v273_v60 = vpop.xlane.xlu0 %272 }
 0x100   :  { %v198_v62 = vrot.slane %v197_v58, 2  ;;  %v274_v63 = vrot.slane %v273_v60, 4 }
 0x102   :  { %v275_v2 = vadd.f32 %v274_v63, %v273_v60  ;;  %v199_v3 = vadd.f32 %v198_v62, %v197_v58 }
 0x104   :  { %v276_v7 = vrot.slane %v275_v2, 2  ;;  %v200_v8 = vrot.slane %v199_v3, 1 }
 0x106   :  { %v277_v12 = vadd.f32 %v276_v7, %v275_v2  ;;  %v201_v13 = vadd.f32 %v200_v8, %v199_v3 }
 0x108   :  { %313 = vpush %v201_v13  ;;  %v278_v19 = vrot.slane %v277_v12, 1 }
 0x109   :  { %315 = vpush %v214_v15 }
 0x10a   :  { %317 = vpush %v227_v18  ;;  %v279_v22 = vadd.f32 %v278_v19, %v277_v12 }
 0x10b   :  { %319 = vpush %v240_v20 }
 0x10c   :  { %321 = vpush %v253_v21 }
 0x10d   :  { %323 = vpush %v266_v23 }
 0x10e   :  { %325 = vpush %v279_v22 }
 0x139   :  { %s314_s7 = spop %313 }
 0x13a   :  { %204 = sst [smem:[#allocation14]] %s314_s7  ;;  %s316_s10 = spop %315 }
 0x13b   :  { %217 = sst [smem:[#allocation14 + $0x1]] %s316_s10  ;;  %s318_s11 = spop %317 }
 0x13c   :  { %230 = sst [smem:[#allocation14 + $0x2]] %s318_s11  ;;  %s320_s12 = spop %319 }
 0x13d   :  { %243 = sst [smem:[#allocation14 + $0x3]] %s320_s12  ;;  %s322_s13 = spop %321 }
 0x13e   :  { %256 = sst [smem:[#allocation14 + $0x4]] %s322_s13  ;;  %s324_s14 = spop %323 }
 0x13f   :  { %269 = sst [smem:[#allocation14 + $0x5]] %s324_s14  ;;  %s326_s15 = spop %325 }
 0x140   :  { %282 = sst [smem:[#allocation14 + $0x6]] %s326_s15 }
 0x141   :  { %300 = dma.smem_to_hbm %s482_s16, 16, %s582_s8, [#allocation6]  }
 0x142   :  { %471 = dma.done.wait [#allocation5], 64  }
 0x143   :  { %472 = vsyncadd [#allocation5], 4294967232 }
 0x144   :  { %473 = dma.done.wait [#allocation6], 16  }
 0x145   :  { %474 = vsyncadd [#allocation6], 4294967280 }
 0x146   :  { %307 = sfence }
 0x147   :  { %308 = vsyncpa [#allocation4], 1 }
 0x148   :  { %309 = vsyncpa [#allocation8], 1 }
 0x149   :  { %310 = vsyncpa [#allocation11], 1 }
 0x14a   :  { %311 = vsyncpa [#allocation5], 1 }
 0x14b   :  { %312 = vsyncpa [#allocation6], 1 }

</bundles_post_ra>
